<compile_context>
chip_gen: v7x
topology: tpu7x:2x2x1
jax: 0.10.0
libtpu: 0.0.40
codegen_flags: <defaults>
</compile_context>

<pallas_src>
import jax
import jax.numpy as jnp
from jax.experimental import pallas as pl
from jax.experimental.pallas import tpu as pltpu


def _focus_conv_kernel(x_ref, w_ref, shift_ref, o_ref):
    # x_ref:     (K, TM)   channel-major space-to-depth pixels (pixels on lanes), bf16
    # w_ref:     (C2, K)   1x1 conv weight with BN scale folded in, bf16
    # shift_ref: (C2, 1)   folded BN shift = beta - mean * gamma / sqrt(var + eps), f32
    # o_ref:     (C2, TM)  lane-dense output tile
    acc = jnp.dot(w_ref[...], x_ref[...], preferred_element_type=jnp.float32)
    y = acc + shift_ref[...]                      # f32 epilogue (keep; free under HBM roofline)
    o_ref[...] = (y * jax.nn.sigmoid(y)).astype(o_ref.dtype)   # SiLU


def focus_forward(x, conv_w, bn_gamma, bn_beta, bn_mean, bn_var,
                  eps=1e-5, tm=8192, compute_dtype=jnp.bfloat16, out_dtype=None):
    """Focus.forward: x (N, c1, H, W) -> (N, c2, H/2, W/2). BN in eval mode."""
    N, c1, H, W = x.shape
    c2 = conv_w.shape[0]
    assert conv_w.shape == (c2, 4 * c1, 1, 1)
    assert H % 2 == 0 and W % 2 == 0, "Focus requires even H and W"
    H2, W2 = H // 2, W // 2
    K = 4 * c1
    HW = H2 * W2
    if out_dtype is None:
        out_dtype = x.dtype

    # ---- space-to-depth (single fused XLA pre-pass), torch.cat channel order ----
    # Built directly in channel-major (N, K, H2*W2) layout == flattened NCHW output
    # of the gather, so no layout transpose is needed around the kernel.
    xc = jnp.concatenate(
        (x[..., ::2, ::2], x[..., 1::2, ::2], x[..., ::2, 1::2], x[..., 1::2, 1::2]),
        axis=1)                                          # (N, 4*c1, H2, W2)
    xm = xc.reshape(N, K, HW).astype(compute_dtype)      # (N, K, HW), bf16 intermediate

    # ---- fold BN (eval mode): scale into weight, shift passed separately ----
    scale = bn_gamma / jnp.sqrt(bn_var + eps)                               # (c2,)
    w = (conv_w.reshape(c2, K) * scale[:, None]).astype(compute_dtype)      # (c2, K)
    shift = (bn_beta - bn_mean * scale).reshape(c2, 1).astype(jnp.float32)  # (c2, 1)

    # ---- pixel-tile (lane dim) selection ----
    in_b = jnp.dtype(compute_dtype).itemsize
    out_b = jnp.dtype(out_dtype).itemsize
    bytes_per_pixel = K * in_b + c2 * out_b
    # Keep double-buffered x + out tiles under ~16 MiB: safe headroom on v7x (64 MiB
    # physical / 32 MiB default scoped) and v5e (16 MiB default scoped).
    vmem_budget = 16 * 1024 * 1024
    max_tm_vmem = max(128, ((vmem_budget // (2 * bytes_per_pixel)) // 128) * 128)
    tm = min(int(tm), max_tm_vmem)
    if N == 1 and HW >= 256:
        # v7x megacore: guarantee >= 2 blocks on the parallel grid when batch == 1.
        tm = min(tm, ((pl.cdiv(HW, 2) + 127) // 128) * 128)
    if HW <= tm:
        tm = HW                                   # full extent (always legal lane dim)
    else:
        tm = max(128, (tm // 128) * 128)          # multiple of 128 lanes
    num_m = pl.cdiv(HW, tm)                       # ragged last block handled by Pallas

    out = pl.pallas_call(
        _focus_conv_kernel,
        out_shape=jax.ShapeDtypeStruct((N, c2, HW), out_dtype),
        grid_spec=pltpu.PrefetchScalarGridSpec(
            num_scalar_prefetch=0,
            grid=(N, num_m),
            in_specs=[
                pl.BlockSpec((None, K, tm), lambda n, i: (n, 0, i)),  # x tile
                pl.BlockSpec((c2, K), lambda n, i: (0, 0)),           # weight (resident)
                pl.BlockSpec((c2, 1), lambda n, i: (0, 0)),           # shift  (resident)
            ],
            out_specs=pl.BlockSpec((None, c2, tm), lambda n, i: (n, 0, i)),
        ),
        compiler_params=pltpu.CompilerParams(
            dimension_semantics=("parallel", "parallel")),
    )(xm, w, shift)

    # (N, c2, HW) is already NCHW-flat; reshape is free.
    return out.reshape(N, c2, H2, W2)


if __name__ == "__main__":
    key = jax.random.PRNGKey(0)
    k_x, k_w, k_g, k_b, k_m, k_v = jax.random.split(key, 6)

    # Small shapes consistent with Focus: batch=2, c1=4, H=W=16, c2=8.
    N, c1, H, W, c2 = 2, 4, 16, 16, 8

    x = jax.random.normal(k_x, (N, c1, H, W), dtype=jnp.float32)

    # Deterministic synthetic parameters (shapes from nn.Conv2d / nn.BatchNorm2d).
    conv_w = jax.random.normal(k_w, (c2, 4 * c1, 1, 1), dtype=jnp.float32) * 0.1
    bn_gamma = 1.0 + 0.1 * jax.random.normal(k_g, (c2,), dtype=jnp.float32)
    bn_beta = 0.1 * jax.random.normal(k_b, (c2,), dtype=jnp.float32)
    bn_mean = 0.05 * jax.random.normal(k_m, (c2,), dtype=jnp.float32)
    bn_var = jnp.abs(1.0 + 0.1 * jax.random.normal(k_v, (c2,), dtype=jnp.float32))

    y = focus_forward(x, conv_w, bn_gamma, bn_beta, bn_mean, bn_var)
    jax.block_until_ready(y)
    assert y.shape == (N, c2, H // 2, W // 2)
    assert y.dtype == x.dtype

    # ---- references of the same math ----
    eps = 1e-5
    p = jnp.concatenate(
        (x[..., ::2, ::2], x[..., 1::2, ::2], x[..., ::2, 1::2], x[..., 1::2, 1::2]),
        axis=1)
    sc = bn_gamma / jnp.sqrt(bn_var + eps)
    sh = (bn_beta - bn_mean * sc)[None, :, None, None]

    # Reference 1: identical quantization path (bf16 inputs + folded weight, f32 accum).
    wq = (conv_w.reshape(c2, 4 * c1) * sc[:, None]).astype(jnp.bfloat16).astype(jnp.float32)
    pq = p.astype(jnp.bfloat16).astype(jnp.float32)
    ref_q = jnp.einsum("nkhw,ok->nohw", pq, wq, precision=jax.lax.Precision.HIGHEST) + sh
    ref_q = ref_q * jax.nn.sigmoid(ref_q)
    assert jnp.max(jnp.abs(y - ref_q)) < 2e-3, float(jnp.max(jnp.abs(y - ref_q)))

    # Reference 2: full-f32 math of the original module (loose, bf16 compute error bound).
    ref = jnp.einsum("nkhw,ok->nohw", p, conv_w.reshape(c2, 4 * c1),
                     precision=jax.lax.Precision.HIGHEST)
    ref = ref * sc[None, :, None, None] + sh
    ref = ref * jax.nn.sigmoid(ref)
    assert jnp.max(jnp.abs(y - ref)) < 5e-2, float(jnp.max(jnp.abs(y - ref)))

    # ---- bf16-output path (feedback: halve the dominant output write when wanted) ----
    y_bf16 = focus_forward(x, conv_w, bn_gamma, bn_beta, bn_mean, bn_var,
                           out_dtype=jnp.bfloat16)
    jax.block_until_ready(y_bf16)
    assert y_bf16.dtype == jnp.bfloat16
    assert jnp.max(jnp.abs(y_bf16.astype(jnp.float32) - ref_q)) < 3e-2

    print("KERNEL_OK")
</pallas_src>

<mosaic_0001>
module attributes {stable_mosaic.version = 11 : i64} {
  func.func @_focus_conv_kernel(%arg0: i32, %arg1: i32, %arg2: memref<1x16x64xbf16, #tpu.memory_space<vmem>>, %arg3: memref<8x16xbf16, #tpu.memory_space<vmem>>, %arg4: memref<8x1xf32, #tpu.memory_space<vmem>>, %arg5: memref<1x8x64xf32, #tpu.memory_space<vmem>>) attributes {dimension_semantics = [#tpu.dimension_semantics<parallel>, #tpu.dimension_semantics<parallel>], iteration_bounds = array<i64: 2, 1>, scalar_prefetch = 0 : i64, scratch_operands = 0 : i64, tpu.core_type = #tpu.core_type<tc>, window_params = [{transform_indices = @transform_0, window_bounds = array<i64: 1, 16, 64>}, {pipeline_mode = #tpu.pipeline_mode<synchronous>, transform_indices = @transform_1, window_bounds = array<i64: 8, 16>}, {pipeline_mode = #tpu.pipeline_mode<synchronous>, transform_indices = @transform_2, window_bounds = array<i64: 8, 1>}, {transform_indices = @transform_3, window_bounds = array<i64: 1, 8, 64>}]} {
    %c0 = arith.constant 0 : index
    %c0_0 = arith.constant 0 : index
    %0 = vector.load %arg3[%c0, %c0_0] : memref<8x16xbf16, #tpu.memory_space<vmem>>, vector<8x16xbf16>
    %c0_1 = arith.constant 0 : index
    %c0_2 = arith.constant 0 : index
    %c0_3 = arith.constant 0 : index
    %1 = vector.load %arg2[%c0_1, %c0_2, %c0_3] : memref<1x16x64xbf16, #tpu.memory_space<vmem>>, vector<1x16x64xbf16>
    %2 = vector.shape_cast %1 : vector<1x16x64xbf16> to vector<16x64xbf16>
    %cst = arith.constant dense<0.000000e+00> : vector<8x64xf32>
    %3 = tpu.matmul %0, %2, %cst {dimension_numbers = #tpu.dot_dimension_numbers<[1], [0], [0], [1], [0, 0, 1, 1], [], []>} : vector<8x16xbf16>, vector<16x64xbf16>, vector<8x64xf32> -> vector<8x64xf32>
    %c0_4 = arith.constant 0 : index
    %c0_5 = arith.constant 0 : index
    %4 = vector.load %arg4[%c0_4, %c0_5] : memref<8x1xf32, #tpu.memory_space<vmem>>, vector<8x1xf32>
    %5 = vector.broadcast %4 : vector<8x1xf32> to vector<8x64xf32>
    %6 = arith.addf %3, %5 : vector<8x64xf32>
    %7 = arith.negf %6 : vector<8x64xf32>
    %8 = math.exp %7 : vector<8x64xf32>
    %cst_6 = arith.constant 1.000000e+00 : f32
    %9 = vector.broadcast %cst_6 : f32 to vector<8x64xf32>
    %10 = arith.addf %9, %8 : vector<8x64xf32>
    %11 = arith.divf %9, %10 : vector<8x64xf32>
    %12 = arith.mulf %6, %11 : vector<8x64xf32>
    %c0_7 = arith.constant 0 : index
    %c0_8 = arith.constant 0 : index
    %c0_9 = arith.constant 0 : index
    %13 = vector.load %arg5[%c0_7, %c0_8, %c0_9] : memref<1x8x64xf32, #tpu.memory_space<vmem>>, vector<1x8x64xf32>
    %14 = vector.shape_cast %13 : vector<1x8x64xf32> to vector<8x64xf32>
    %15 = vector.shape_cast %12 : vector<8x64xf32> to vector<1x8x64xf32>
    tpu.vector_store %arg5[%c0_7, %c0_8, %c0_9], %15 {strides = array<i32>} : memref<1x8x64xf32, #tpu.memory_space<vmem>>, vector<1x8x64xf32>,
    return
  }
  func.func @transform_0(%arg0: i32, %arg1: i32) -> (i32, i32, i32) {
    %c0_i32 = arith.constant 0 : i32
    %c0_i32_0 = arith.constant 0 : i32
    return %arg0, %c0_i32, %arg1 : i32, i32, i32
  }
  func.func @transform_1(%arg0: i32, %arg1: i32) -> (i32, i32) {
    %c0_i32 = arith.constant 0 : i32
    %c0_i32_0 = arith.constant 0 : i32
    %c0_i32_1 = arith.constant 0 : i32
    return %c0_i32, %c0_i32_0 : i32, i32
  }
  func.func @transform_2(%arg0: i32, %arg1: i32) -> (i32, i32) {
    %c0_i32 = arith.constant 0 : i32
    %c0_i32_0 = arith.constant 0 : i32
    %c0_i32_1 = arith.constant 0 : i32
    return %c0_i32, %c0_i32_0 : i32, i32
  }
  func.func @transform_3(%arg0: i32, %arg1: i32) -> (i32, i32, i32) {
    %c0_i32 = arith.constant 0 : i32
    %c0_i32_0 = arith.constant 0 : i32
    return %arg0, %c0_i32, %arg1 : i32, i32, i32
  }
}

</mosaic_0001>

<bundles_post_ra>
// kernel: tpu_custom_call.1
= control target key start
LH: loop header
LB: loop body
LE: loop exit
PB: predicated region body
PF: predicated region fallthrough
CT: control target
= control target key end

     0   :  { %8 = vsyncpa [#allocation3], 0  ;;  %s794_s0 = inlined_call_operand.hbm [shape: bf16[2,16,64], index: 0, kind: input, shape index: {}]   ;;  %s795_s1 = inlined_call_operand.vmem [shape: bf16[8,16], index: 1, kind: input, shape index: {}]   ;;  %s796_s2 = inlined_call_operand.vmem [shape: f32[8,1], index: 2, kind: input, shape index: {}]   ;;  %s797_s3 = inlined_call_operand.hbm [shape: f32[2,8,64], index: 3, kind: output, shape index: {}]  }
   0x1   :  { %10 = vsyncpa [#allocation3 + $0x1], 0 }
   0x2   :  { %11 = vsyncpa [#allocation4], 0 }
   0x3   :  { %13 = vsyncpa [#allocation4 + $0x1], 0  ;;  %s611_s12 = smov 0   ;;  %s613_s13 = smov 0  }
   0x4   :  { %s615_s14 = smov 0   ;;  %s617_s15 = smov 0  }
   0x5   :  { %s619_s16 = smov 0   ;;  %s621_s17 = smov 0  }
   0x6 LB: > { %s371_s18 = sadd.s32 4294967295, %s582_s17   ;;  %s372_s19 = sadd.s32 4294967294, %s582_s17   ;;  %s582_s17 = sphi %s621_s17, %s19_s17   ;;  %s578_s16 = sphi %s619_s16, %s812_s16   ;;  %s574_s15 = sphi %s617_s15, %s811_s15   ;;  %s570_s14 = sphi %s615_s14, %s810_s14   ;;  %s566_s13 = sphi %s613_s13, %s809_s13   ;;  %s562_s12 = sphi %s611_s12, %s808_s12  }
   0x7   : > { %s31_s20 = sadd.s32 1, %s578_s16  ;;  %s40_s21 = sadd.s32 1, %s570_s14 }
   0x8   : > { %p33_p0 = scmp.ge.s32.totalorder %s31_s20, 2  ;;  %p47_p1 = scmp.ne.s32.totalorder %s570_s14, %s566_s13 }
   0x9   : > { %p48_p2 = scmp.eq.s32.totalorder %s582_s17, 0  ;;  %p53_p3 = scmp.ne.s32.totalorder %s566_s13, %s562_s12 }
   0xa   : > { %s814_s20 = smov (%p33_p0, %s31_s20), 0  ;;  %p54_p5 = scmp.eq.s32.totalorder %s371_s18, 0 }
   0xb   : > { %p652_p4 = por %p48_p2, %p47_p1  ;;  %s35_s23 = ssub.s32 %s578_s16, %s814_s20 }
   0xc   : > { %p121_p6 = scmp.eq.s32.totalorder %s371_s18, 1  ;;  %p38_p7 = scmp.eq.s32.totalorder %s35_s23, 0 }
   0xd   : > { %p658_p8 = por %p54_p5, %p53_p3  ;;  %p127_p10 = scmp.eq.s32.totalorder %s372_s19, 1 }
   0xe   : > { %p662_p9 = por %p121_p6, %p47_p1  ;;  %p409_p13 = scmp.lt.s32.totalorder %s582_s17, 2 }
   0xf   : > { %s667_s26 = scalar_select %p38_p7, %s570_s14, %s40_s21  }
  0x10   : > { %s801_s25 = scalar_select %p662_p9, 1, 0 }
  0x11   : > { %p669_p11 = por %p127_p10, %p53_p3  ;;  %s153_s28 = sand.u32 1, %s570_s14  }
  0x12   : > { %s375_s29 = sshll.u32 %s153_s28, 3  ;;  %s388_s30 = sshll.u32 %s578_s16, 7 }
  0x13   : > { %s802_s27 = scalar_select %p669_p11, 1, 0 }
  0x14   : > { %s680_s6 = scalar_lea.hbm %s794_s0, %s388_s30  ;;  %s157_s7 = scalar_lea.vmem [#allocation2], %s375_s29 }
  0x15   : > { %s165_s8 = sshll.u32 %s157_s7, 4  ;;  %p686_p0 = pnand %p409_p13, %p652_p4  ;;  %s682_s8 = int_to_ptr.vmem [resolvable:$true] %s165_s8 }
  0x16   : > { %s691_s10 = scalar_lea.sflag [#allocation3], %s153_s28  ;;  %s470_s11 = scalar_lea.hbm %s680_s6, 128 }
  0x17   : > { %p471_p2 = scmp.ne.s32.totalorder %s680_s6, %s470_s11  ;;  %p472_p3 = pneg %p686_p0 }
  0x18   : > { %s475_s21 = scalar_lea.hbm %s794_s0, 256  ;;  %p476_p4 = scmp.lt.u32.totalorder %s680_s6, %s794_s0 }
  0x19   : > { %p473_p5 = pnand %p472_p3, %p471_p2  ;;  %p477_p7 = scmp.lt.u32.totalorder %s475_s21, %s470_s11 }
  0x1a   : > { %p479_p13 = scmp.lt.u32.totalorder %s470_s11, %s680_s6 }
  0x1b   : > { %p474_p6 = pneg %p473_p5  ;;  %p478_p10 = por %p477_p7, %p476_p4 }
  0x1d   : > { %p480_p12 = por %p479_p13, %p478_p10 }
  0x1f   : > { %p481_p1 = pnand %p480_p12, %p474_p6 }
  0x21   : > { %484 = shalt.err (!%p481_p1)
}
  0x22   : > { %s485_s28 = scalar_lea.vmem %s682_s8, 128  ;;  %s584_s29 = smov [#allocation2]  }
  0x23   : > { %p486_p2 = scmp.ne.s32.totalorder %s682_s8, %s485_s28  ;;  %s490_s30 = sshll.u32 %s584_s29, 4  ;;  %s491_s30 = int_to_ptr.vmem [resolvable:$false] %s490_s30 }
  0x24   : > { %s492_s4 = scalar_lea.vmem %s491_s30, 256  ;;  %p493_p9 = scmp.lt.s32.totalorder %s682_s8, %s491_s30 }
  0x25   : > { %p488_p5 = pnand %p486_p2, %p472_p3  ;;  %p494_p4 = scmp.lt.s32.totalorder %s492_s4, %s485_s28 }
  0x27   : > { %p489_p11 = pneg %p488_p5  ;;  %p495_p7 = por %p494_p4, %p493_p9 }
  0x29   : > { %p496_p10 = pnand %p495_p7, %p489_p11 }
  0x2b   : > { %499 = shalt.err (!%p496_p10)
}
  0x2c   : > { %s585_s5 = smov 64   ;;  %s586_s7 = smov 4  }
  0x2d   : > { %404 = dma.hbm_to_vmem [thread:$0]  (!%p686_p0), %s680_s6, 128, %s682_s8, %s691_s10, %s585_s5, %s585_s5, %s586_s7  }
  0x2e   : > { %p173_p12 = scmp.lt.s32.totalorder %s582_s17, 3  ;;  %p804_p1 = scmp.ge.s32.totalorder %s582_s17, 1 }
  0x30   : > { %p174_p3 = pnand %p804_p1, %p173_p12 }
  0x31   : > { %s723_s11 = sand.u32 (!%p174_p3), 1, %s566_s13  }
  0x32   : > { %177 = sbr.rel (%p174_p3) target bundleno = 319 (0x13f), region = 32  ;;  %s379_s18 = sshll.u32 (!%p174_p3), %s723_s11, 3 }
  0x33   : > { %s180_s19 = scalar_lea.sflag (!%p174_p3), [#allocation3], %s723_s11  ;;  %s183_s21 = scalar_lea.vmem (!%p174_p3), [#allocation2], %s379_s18 }
  0x39   : > { %553 = dma.done.wait (%p658_p8), %s180_s19, 128  }
  0x3a   : > { %555 = vsyncadd (%p658_p8), %s180_s19, 4294967168  ;;  %v587_v0 = vmov 0.0   ;;  %vm588_vm0 = vmmov 0   ;;  %v589_v1 = vmov 0   ;;  %v465_v2 = vld [vmem:[%s183_s21] sm:$0xff]   ;;  %vm222_vm1 = vcmask 130048  }
  0x3b   : > { %391 = vmatprep.subr.bf16.mxu0 %v587_v0  ;;  %393 = vmatprep.mubr.msk.bf16.mxu0 %vm588_vm0, %v587_v0  ;;  %v210_v3 = vld [vmem:[%s796_s2] sm:$0xff]  ;;  %s385_s24 = sshll.u32 %s574_s15, 7  ;;  %s205_s22 = scalar_lea.vmem [#allocation5], %s379_s18  ;;  %vm273_vm2 = vcmask 523264  }
  0x3c   : > { %464 = vset.pattern.permute.xlu0 %v589_v1  ;;  %392 = vmatpush3.bf16.msra.mxu0 %v465_v2  ;;  %v207_v4 = vld [vmem:[%s795_s1] sm:$0xf]  ;;  %s290_s23 = sshll.u32 %s205_s22, 4  ;;  %s745_s30 = scalar_lea.hbm %s797_s3, %s385_s24  ;;  %s747_s23 = int_to_ptr.vmem [resolvable:$true] %s290_s23 }
  0x3d   : > { %213 = vperm.xlu0 %464, %v210_v3   ;;  %s276_s4 = scalar_lea.sflag [#allocation4], %s723_s11  ;;  %s500_s5 = scalar_lea.vmem %s747_s23, 128 }
  0x3e   : > { %p501_p8 = scmp.ne.s32.totalorder %s747_s23, %s500_s5  ;;  %p805_p9 = scmp.ne.s32.totalorder %s801_s25, 0 }
  0x3f   : > { %394 = vmatmul.mubr.msk.bf16.vlgmr.msra.gmra.mrb[0].mxu0 %vm222_vm1, %v207_v4  ;;  %s590_s15 = smov [#allocation5]  }
  0x40   : > { %p502_p11 = pnand %p501_p8, %p805_p9  ;;  %s504_s7 = sshll.u32 %s590_s15, 4  ;;  %s505_s7 = int_to_ptr.vmem [resolvable:$false] %s504_s7 }
  0x41   : > { %s506_s18 = scalar_lea.vmem %s505_s7, 256  ;;  %p507_p6 = scmp.lt.s32.totalorder %s747_s23, %s505_s7 }
  0x42   : > { %p503_p0 = pneg %p502_p11  ;;  %p508_p13 = scmp.lt.s32.totalorder %s506_s18, %s500_s5 }
  0x44   : > { %p509_p2 = por %p508_p13, %p507_p6 }
  0x46   : > { %p510_p5 = pnand %p509_p2, %p503_p0 }
  0xbc   : > { %v214_v5 = vpop.permute.xlu0 %213 }
 0x112   : > { %v260_v6 = vpop.f32.mrb[0].mxu0 }
 0x113   : > { %v261_v7 = vadd.f32 %v260_v6, %v214_v5  ;;  %v395_v8 = vpop.f32.mrb[1].mxu0 }
 0x114   : > { %v263_v9 = vpop.f32.mrb[2].mxu0 }
 0x115   : > { %v383_v10 = vmul.f32 -1.442695, %v261_v7  ;;  %v396_v11 = vpop.f32.mrb[3].mxu0 }
 0x117   : > { %466 = vpow2.f32 %v383_v10 }
 0x121   : > { %v467_v12 = vpop.eup %466 }
 0x122   : > { %v269_v13 = vadd.f32 1.0, %v467_v12 }
 0x124   : > { %468 = vrcp.f32 %v269_v13 }
 0x12e   : > { %v469_v14 = vpop.eup %468 }
 0x12f   : > { %v272_v15 = vmul.f32 %v469_v14, %v261_v7 }
 0x131   : > { %274 = vst.msk [vmem:[%s205_s22] sm:$0xff] %vm273_vm2, %v272_v15 }
 0x132   : > { %513 = shalt.err (!%p510_p5)
}
 0x133   : > { %s514_s11 = scalar_lea.hbm %s745_s30, 128  ;;  %s518_s6 = scalar_lea.hbm %s797_s3, 256 }
 0x134   : > { %p515_p4 = scmp.ne.s32.totalorder %s745_s30, %s514_s11  ;;  %p519_p12 = scmp.lt.u32.totalorder %s745_s30, %s797_s3 }
 0x135   : > { %p520_p1 = scmp.lt.u32.totalorder %s518_s6, %s514_s11  ;;  %p522_p8 = scmp.lt.u32.totalorder %s514_s11, %s745_s30 }
 0x136   : > { %p516_p7 = pnand %p515_p4, %p805_p9 }
 0x137   : > { %p521_p3 = por %p520_p1, %p519_p12 }
 0x138   : > { %p517_p10 = pneg %p516_p7 }
 0x139   : > { %p523_p11 = por %p522_p8, %p521_p3 }
 0x13b   : > { %p524_p0 = pnand %p523_p11, %p517_p10 }
 0x13d   : > { %527 = shalt.err (!%p524_p0)
}
 0x13e   : > { %399 = dma.vmem_to_hbm [thread:$0]  (%p805_p9), %s747_s23, 128, %s745_s30, %s276_s4  }
 0x13f PF: > { %s302_s10 = sand.u32 1, %s562_s12   ;;  %p806_p6 = scmp.ne.s32.totalorder %s802_s27, 0 }
 0x140   : > { %p807_p13 = scmp.ge.s32.totalorder %s582_s17, 2  ;;  %s303_s24 = scalar_lea.sflag [#allocation4], %s302_s10 }
 0x142   : > { %p406_p2 = pnand %p807_p13, %p806_p6 }
 0x144   : > { %557 = dma.done.wait (!%p406_p2), %s303_s24, 128  }
 0x145   : > { %559 = vsyncadd (!%p406_p2), %s303_s24, 4294967168  ;;  %s19_s17 = sadd.s32 1, %s582_s17   ;;  %s808_s12 = smov %s566_s13 }
 0x146   : > { %p16_p5 = scmp.ge.s32.totalorder %s19_s17, 4   ;;  %s809_s13 = smov %s570_s14 }
 0x147   : > { %s810_s14 = smov %s667_s26  ;;  %s811_s15 = smov %s578_s16 }
 0x148   : > { %s812_s16 = smov %s814_s20  ;;  %18 = sbr.rel (!%p16_p5) target bundleno = 6 (0x6), region = 77 }
 0x14f   :  { %308 = vsyncpa [#allocation3], 1 }
 0x150   :  { %310 = vsyncpa [#allocation3 + $0x1], 1 }
 0x151   :  { %311 = vsyncpa [#allocation4], 1 }
 0x152   :  { %313 = vsyncpa [#allocation4 + $0x1], 1 }

</bundles_post_ra>
